<compile_context>
chip_gen: v7x
topology: tpu7x:2x2x1
jax: 0.10.0
libtpu: 0.0.40
codegen_flags: <defaults>
</compile_context>

<pallas_src>
import functools

import jax
import jax.numpy as jnp
from jax.experimental import pallas as pl
from jax.experimental.pallas import tpu as pltpu


# ----------------------------- Pallas kernels ------------------------------ #

def _upsample_kernel(x_ref, w_ref, b_ref, o_ref):
    # ConvTranspose2d(kernel=stride=s) is a per-pixel matmul:
    #   out[m, co*s*s + a*s + b] = sum_ci x[m, ci] * W[ci, co, a, b] + bias[co]
    o_ref[...] = (
        jnp.dot(x_ref[...], w_ref[...], preferred_element_type=jnp.float32)
        + b_ref[...]
    )


def _conv_bias_relu_stats_kernel(x_hbm, w_ref, b_ref, mask_ref,
                                 y_ref, stats_ref, xbuf, sem,
                                 *, tile_m, halo, tap_offsets):
    """Pass 1: 3x3 conv + bias + ReLU + per-channel (sum, sum_sq) accumulation.

    x_hbm : (Mtot + halo, C) guard-padded flattened activations, left in HBM.
    xbuf  : (2, tile_m + halo, C) VMEM double buffer (manual DMA).
    """
    t = pl.program_id(0)
    nt = pl.num_programs(0)

    def start_fetch(tile_idx, slot):
        pltpu.make_async_copy(
            x_hbm.at[pl.ds(tile_idx * tile_m, tile_m + halo)],
            xbuf.at[slot],
            sem.at[slot],
        ).start()

    @pl.when(t == 0)
    def _():
        stats_ref[...] = jnp.zeros_like(stats_ref)
        start_fetch(0, 0)                         # prime the pipeline

    slot = jax.lax.rem(t, 2)
    # wait for the current tile's window
    pltpu.make_async_copy(
        x_hbm.at[pl.ds(t * tile_m, tile_m + halo)],
        xbuf.at[slot],
        sem.at[slot],
    ).wait()

    # prefetch the next tile's window while we compute on this one
    @pl.when(t + 1 < nt)
    def _():
        start_fetch(t + 1, 1 - slot)

    xwin = xbuf.at[slot]                          # (tile_m + halo, C) VMEM view
    # Build the 9 shifted taps in-VMEM (no HBM im2col) and fuse the nine K=C
    # matmuls into a single K=9*C MXU matmul.
    taps = [xwin[off:off + tile_m, :] for off in tap_offsets]
    patches = jnp.concatenate(taps, axis=1)       # (tile_m, 9*C)
    acc = jnp.dot(patches, w_ref[...], preferred_element_type=jnp.float32)
    acc = jnp.maximum(acc + b_ref[...], 0.0)      # bias + ReLU
    y_ref[...] = acc

    # BatchNorm2d training statistics: accumulate masked per-channel sums.
    m = mask_ref[...]                             # (tile_m, 1): 1 = valid pixel
    acc_m = acc * m
    stats_ref[0:1, :] += jnp.sum(acc_m, axis=0, keepdims=True)
    stats_ref[1:2, :] += jnp.sum(acc_m * acc, axis=0, keepdims=True)


def _bn_apply_kernel(y_ref, scale_ref, shift_ref, o_ref):
    # Pass 2: apply the global-batch BN affine (gamma/sqrt(var+eps), shifted).
    o_ref[...] = y_ref[...] * scale_ref[...] + shift_ref[...]


# ------------------------------ JAX wrapper -------------------------------- #

def _round_up(x, m):
    return (x + m - 1) // m * m


def dcan_deconv_forward(x, params, upscale, *, up_tile=256, conv_tile=512):
    """x: (N, Cin, H, W) float32 NCHW. Returns (N, Cout, H*s, W*s) NCHW."""
    n, cin, h, w = x.shape
    s = upscale
    cout = params["up_b"].shape[0]
    hs, ws = h * s, w * s

    # ---------------- stage 1: ConvTranspose2d upscaling (tiled) ---------------- #
    m1 = n * h * w
    t1 = min(up_tile, _round_up(m1, 8))
    m1p = _round_up(m1, t1)
    x2d = jnp.transpose(x, (0, 2, 3, 1)).reshape(m1, cin)
    x2d = jnp.pad(x2d, ((0, m1p - m1), (0, 0)))
    wt = params["up_w"].reshape(cin, cout * s * s)        # [ci, co*s*s + a*s + b]
    b_up = jnp.repeat(params["up_b"], s * s)[None, :]     # (1, Cout*s*s)

    up2d = pl.pallas_call(
        _upsample_kernel,
        out_shape=jax.ShapeDtypeStruct((m1p, cout * s * s), jnp.float32),
        grid=(m1p // t1,),
        in_specs=[
            pl.BlockSpec((t1, cin), lambda i: (i, 0)),
            pl.BlockSpec((cin, cout * s * s), lambda i: (0, 0)),
            pl.BlockSpec((1, cout * s * s), lambda i: (0, 0)),
        ],
        out_specs=pl.BlockSpec((t1, cout * s * s), lambda i: (i, 0)),
        compiler_params=pltpu.CompilerParams(dimension_semantics=("parallel",)),
    )(x2d, wt, b_up)

    # (N,H,W,Cout,s,s) -> upscaled NHWC (N, Hs, Ws, Cout)
    up = up2d[:m1].reshape(n, h, w, cout, s, s)
    up = jnp.transpose(up, (0, 1, 4, 2, 5, 3)).reshape(n, hs, ws, cout)
    # TODO(synk): this rearrange is one XLA copy; it could be folded into the
    # upsample kernel with strided sub-row stores if it ever shows up hot.

    # ------------- stage 2: 3x3 conv + bias + ReLU + BN stats (pass 1) ---------- #
    # Channels-last, spatially flattened padded layout:
    #   row m = n*(Hs+2)*(Ws+2) + pi*(Ws+2) + pj, channels in lanes.
    # The 3x3 taps of row m live at rows m + (ky-1)*(Ws+2) + (kx-1), so one tile of
    # tile_m rows only needs a (tile_m + 2*(Ws+3))-row window of the guarded input.
    hp, wp = hs + 2, ws + 2
    mp = n * hp * wp
    tile_m = min(conv_tile, _round_up(mp, 8))
    mtot = _round_up(mp, tile_m)
    base = wp + 1                      # max |tap offset|
    halo = 2 * base

    xpf = jnp.pad(up, ((0, 0), (1, 1), (1, 1), (0, 0))).reshape(mp, cout)
    xpg = jnp.pad(xpf, ((base, base + (mtot - mp)), (0, 0)))   # guard rows
    mask = jnp.pad(
        jnp.pad(jnp.ones((n, hs, ws, 1), jnp.float32),
                ((0, 0), (1, 1), (1, 1), (0, 0))).reshape(mp, 1),
        ((0, mtot - mp), (0, 0)))

    # torch Conv2d weight (Cout, Cin, 3, 3) -> (3,3,Cin,Cout) -> (9*Cin, Cout)
    w9 = jnp.transpose(params["conv_w"], (2, 3, 1, 0)).reshape(9 * cout, cout)
    b_conv = params["conv_b"][None, :]
    # offset of tap (ky,kx) inside the guarded window of a tile:
    #   base + (ky-1)*wp + (kx-1) = ky*wp + kx
    tap_offsets = tuple(ky * wp + kx for ky in range(3) for kx in range(3))

    n_tiles = mtot // tile_m
    kernel2 = functools.partial(
        _conv_bias_relu_stats_kernel,
        tile_m=tile_m, halo=halo, tap_offsets=tap_offsets)

    y_flat, stats = pl.pallas_call(
        kernel2,
        out_shape=(
            jax.ShapeDtypeStruct((mtot, cout), jnp.float32),
            jax.ShapeDtypeStruct((2, cout), jnp.float32),
        ),
        grid=(n_tiles,),
        in_specs=[
            pl.BlockSpec(memory_space=pl.ANY),                  # guarded input (HBM)
            pl.BlockSpec((9 * cout, cout), lambda t: (0, 0)),
            pl.BlockSpec((1, cout), lambda t: (0, 0)),
            pl.BlockSpec((tile_m, 1), lambda t: (t, 0)),
        ],
        out_specs=(
            pl.BlockSpec((tile_m, cout), lambda t: (t, 0)),
            pl.BlockSpec((2, cout), lambda t: (0, 0)),          # resident accumulator
        ),
        scratch_shapes=[
            pltpu.VMEM((2, tile_m + halo, cout), jnp.float32),  # DMA double buffer
            pltpu.SemaphoreType.DMA((2,)),
        ],
        compiler_params=pltpu.CompilerParams(dimension_semantics=("arbitrary",)),
    )(xpg, w9, b_conv, mask)

    # ---------------- BN statistics -> per-channel affine (tiny, XLA) ----------- #
    count = jnp.float32(n * hs * ws)
    mean = stats[0:1] / count
    var = stats[1:2] / count - mean * mean          # biased variance (train mode)
    scale = params["bn_gamma"][None, :] * jax.lax.rsqrt(var + 1e-5)
    shift = params["bn_beta"][None, :] - mean * scale

    # ---------------- stage 3: apply BatchNorm affine (pass 2, tiled) ----------- #
    y_norm = pl.pallas_call(
        _bn_apply_kernel,
        out_shape=jax.ShapeDtypeStruct((mtot, cout), jnp.float32),
        grid=(n_tiles,),
        in_specs=[
            pl.BlockSpec((tile_m, cout), lambda t: (t, 0)),
            pl.BlockSpec((1, cout), lambda t: (0, 0)),
            pl.BlockSpec((1, cout), lambda t: (0, 0)),
        ],
        out_specs=pl.BlockSpec((tile_m, cout), lambda t: (t, 0)),
        compiler_params=pltpu.CompilerParams(dimension_semantics=("parallel",)),
    )(y_flat, scale, shift)

    # TODO(synk): Dropout2d is stochastic in torch train mode; identity (eval) here.

    # crop the spatial padding and return NCHW
    y = y_norm[:mp].reshape(n, hp, wp, cout)[:, 1:1 + hs, 1:1 + ws, :]
    return jnp.transpose(y, (0, 3, 1, 2))


# --------------------------- pure-JAX reference ----------------------------- #

def _reference_forward(x, params, s):
    n, cin, h, w = x.shape
    cout = params["up_b"].shape[0]
    up = jnp.einsum("nchw,cdab->ndhawb", x, params["up_w"],
                    precision=jax.lax.Precision.HIGHEST)
    up = up.reshape(n, cout, h * s, w * s) + params["up_b"][None, :, None, None]
    y = jax.lax.conv_general_dilated(
        up, params["conv_w"], window_strides=(1, 1), padding=((1, 1), (1, 1)),
        dimension_numbers=("NCHW", "OIHW", "NCHW"),
        precision=jax.lax.Precision.HIGHEST,
    ) + params["conv_b"][None, :, None, None]
    y = jnp.maximum(y, 0.0)
    mean = jnp.mean(y, axis=(0, 2, 3), keepdims=True)
    var = jnp.mean((y - mean) ** 2, axis=(0, 2, 3), keepdims=True)
    y = (y - mean) * jax.lax.rsqrt(var + 1e-5)
    return y * params["bn_gamma"][None, :, None, None] + params["bn_beta"][None, :, None, None]


# ---------------------------------- main ------------------------------------ #

if __name__ == "__main__":
    key = jax.random.PRNGKey(0)
    N, Cin, H, W = 2, 4, 16, 16
    Cout, S = 8, 2

    k1, k2, k3, k4, kx = jax.random.split(key, 5)
    params = dict(
        up_w=0.1 * jax.random.normal(k1, (Cin, Cout, S, S), jnp.float32),    # ConvTranspose2d weight
        up_b=0.1 * jax.random.normal(k2, (Cout,), jnp.float32),
        conv_w=0.1 * jax.random.normal(k3, (Cout, Cout, 3, 3), jnp.float32),  # Conv2d weight
        conv_b=0.1 * jax.random.normal(k4, (Cout,), jnp.float32),
        bn_gamma=jnp.ones((Cout,), jnp.float32),
        bn_beta=jnp.zeros((Cout,), jnp.float32),
    )
    x = jax.random.normal(kx, (N, Cin, H, W), jnp.float32)

    out = dcan_deconv_forward(x, params, upscale=S)
    out = jax.block_until_ready(out)

    ref = _reference_forward(x, params, S)
    assert out.shape == (N, Cout, H * S, W * S), out.shape
    assert jnp.allclose(out, ref, atol=1e-2, rtol=1e-2), float(jnp.max(jnp.abs(out - ref)))

    print("KERNEL_OK")
</pallas_src>

<mosaic_0001>
module attributes {stable_mosaic.version = 11 : i64} {
  func.func @_upsample_kernel(%arg0: i32, %arg1: memref<256x4xf32, #tpu.memory_space<vmem>>, %arg2: memref<4x32xf32, #tpu.memory_space<vmem>>, %arg3: memref<1x32xf32, #tpu.memory_space<vmem>>, %arg4: memref<256x32xf32, #tpu.memory_space<vmem>>) attributes {dimension_semantics = [#tpu.dimension_semantics<parallel>], iteration_bounds = array<i64: 2>, scalar_prefetch = 0 : i64, scratch_operands = 0 : i64, tpu.core_type = #tpu.core_type<tc>, window_params = [{transform_indices = @transform_0, window_bounds = array<i64: 256, 4>}, {pipeline_mode = #tpu.pipeline_mode<synchronous>, transform_indices = @transform_1, window_bounds = array<i64: 4, 32>}, {pipeline_mode = #tpu.pipeline_mode<synchronous>, transform_indices = @transform_2, window_bounds = array<i64: 1, 32>}, {transform_indices = @transform_3, window_bounds = array<i64: 256, 32>}]} {
    %c0 = arith.constant 0 : index
    %c0_0 = arith.constant 0 : index
    %0 = vector.load %arg1[%c0, %c0_0] : memref<256x4xf32, #tpu.memory_space<vmem>>, vector<256x4xf32>
    %c0_1 = arith.constant 0 : index
    %c0_2 = arith.constant 0 : index
    %1 = vector.load %arg2[%c0_1, %c0_2] : memref<4x32xf32, #tpu.memory_space<vmem>>, vector<4x32xf32>
    %cst = arith.constant dense<0.000000e+00> : vector<256x32xf32>
    %2 = tpu.matmul %0, %1, %cst {dimension_numbers = #tpu.dot_dimension_numbers<[1], [0], [0], [1], [0, 0, 1, 1], [], []>} : vector<256x4xf32>, vector<4x32xf32>, vector<256x32xf32> -> vector<256x32xf32>
    %c0_3 = arith.constant 0 : index
    %c0_4 = arith.constant 0 : index
    %3 = vector.load %arg3[%c0_3, %c0_4] : memref<1x32xf32, #tpu.memory_space<vmem>>, vector<1x32xf32>
    %4 = vector.broadcast %3 : vector<1x32xf32> to vector<256x32xf32>
    %5 = arith.addf %2, %4 : vector<256x32xf32>
    %c0_5 = arith.constant 0 : index
    %c0_6 = arith.constant 0 : index
    %6 = vector.load %arg4[%c0_5, %c0_6] : memref<256x32xf32, #tpu.memory_space<vmem>>, vector<256x32xf32>
    tpu.vector_store %arg4[%c0_5, %c0_6], %5 {strides = array<i32>} : memref<256x32xf32, #tpu.memory_space<vmem>>, vector<256x32xf32>,
    return
  }
  func.func @transform_0(%arg0: i32) -> (i32, i32) {
    %c0_i32 = arith.constant 0 : i32
    %c0_i32_0 = arith.constant 0 : i32
    return %arg0, %c0_i32 : i32, i32
  }
  func.func @transform_1(%arg0: i32) -> (i32, i32) {
    %c0_i32 = arith.constant 0 : i32
    %c0_i32_0 = arith.constant 0 : i32
    %c0_i32_1 = arith.constant 0 : i32
    return %c0_i32, %c0_i32_0 : i32, i32
  }
  func.func @transform_2(%arg0: i32) -> (i32, i32) {
    %c0_i32 = arith.constant 0 : i32
    %c0_i32_0 = arith.constant 0 : i32
    %c0_i32_1 = arith.constant 0 : i32
    return %c0_i32, %c0_i32_0 : i32, i32
  }
  func.func @transform_3(%arg0: i32) -> (i32, i32) {
    %c0_i32 = arith.constant 0 : i32
    %c0_i32_0 = arith.constant 0 : i32
    return %arg0, %c0_i32 : i32, i32
  }
}

</mosaic_0001>

<bundles_post_ra>
// kernel: tpu_custom_call.1
= control target key start
LH: loop header
LB: loop body
LE: loop exit
PB: predicated region body
PF: predicated region fallthrough
CT: control target
= control target key end

     0   :  { %s795_s12 = smov 0   ;;  %s991_s0 = inlined_call_operand.vmem [shape: f32[512,4], index: 0, kind: input, shape index: {}]   ;;  %s992_s1 = inlined_call_operand.vmem [shape: f32[4,32], index: 1, kind: input, shape index: {}]   ;;  %s993_s2 = inlined_call_operand.vmem [shape: f32[1,32], index: 2, kind: input, shape index: {}]   ;;  %s994_s3 = inlined_call_operand.vmem [shape: f32[512,32], index: 3, kind: output, shape index: {}]  }
   0x1 LB: > { %s629_s13 = sadd.s32 4294967295, %s773_s12   ;;  %p633_p0 = scmp.ge.s32.totalorder %s773_s12, 1  ;;  %s773_s12 = sphi %s795_s12, %s13_s12  }
   0x2   : > { %p138_p1 = scmp.lt.s32.totalorder %s773_s12, 3 }
   0x4   : > { %p139_p2 = pnand %p633_p0, %p138_p1 }
   0x5   : > { %v206_v0 = vld [vmem:[%s992_s1] sm:$0xf] (!%p139_p2)  ;;  %vm311_vm0 = vcmask (!%p139_p2), 1043456   ;;  %s634_s16 = sshll.u32 (!%p139_p2), %s629_s13, 5  ;;  %vm214_vm1 = vcmask (!%p139_p2), 31744   ;;  %vm540_vm2 = vcmask (!%p139_p2), 261120  }
   0x6   : > { %142 = sbr.rel (%p139_p2) target bundleno = 263 (0x107), region = 32  ;;  %707 = vmatprep.subr.msk.mxu0 (!%p139_p2), %vm311_vm0, %v206_v0  ;;  %757 = vmatprep.subr.msk.mxu1 (!%p139_p2), %vm311_vm0, %v206_v0  ;;  %p163_p3 = scmp.lt.s32.totalorder (!%p139_p2), %s634_s16, 63  ;;  %v883_v33 = vld [vmem:[%s993_s2] ss:$0 sm:$0xff] (!%p139_p2) }
   0x7   : > { %708 = vmatpush3.msk.msra.mxu0 (!%p139_p2), %vm311_vm0, %v206_v0  ;;  %758 = vmatpush3.msk.msra.mxu1 (!%p139_p2), %vm311_vm0, %v206_v0 }
   0xd   : > { %s996_s16 = smov (!%p163_p3, %s634_s16), 63 }
   0xe   : > { %s635_s17 = sshll.u32 %s996_s16, 3 }
   0xf   : > { %s814_s20 = scalar_lea.vmem %s991_s0, %s635_s17  ;;  %s890_s25 = scalar_lea.vmem %s994_s3, %s635_s17 }
  0x10   : > { %v174_v1 = vld [vmem:[%s814_s20] sm:$0xff]  ;;  %v175_v3 = vld [vmem:[%s814_s20 + $0x8] sm:$0xff]  ;;  %v176_v5 = vld [vmem:[%s814_s20 + $0x10] sm:$0xff] }
  0x11   : > { %v190_v2 = vld [vmem:[%s814_s20 + $0x80] sm:$0xff]  ;;  %709 = vmatprep.mubr.msk.f32.mxu0 %vm214_vm1, %v174_v1  ;;  %v191_v4 = vld [vmem:[%s814_s20 + $0x88] sm:$0xff]  ;;  %v192_v6 = vld [vmem:[%s814_s20 + $0x90] sm:$0xff] }
  0x12   : > { %733 = vmatprep.mubr.msk.f32.mxu1 %vm214_vm1, %v190_v2  ;;  %710 = vmatmul.mubr.msk.f32.vlgmr.msra.gmra.mrb[0].mxu0 %vm214_vm1, %v175_v3  ;;  %v177_v7 = vld [vmem:[%s814_s20 + $0x18] sm:$0xff]  ;;  %v178_v9 = vld [vmem:[%s814_s20 + $0x20] sm:$0xff]  ;;  %v179_v11 = vld [vmem:[%s814_s20 + $0x28] sm:$0xff] }
  0x13   : > { %734 = vmatmul.mubr.msk.f32.vlgmr.msra.gmra.mrb[0].mxu1 %vm214_vm1, %v191_v4  ;;  %712 = vmatprep.mubr.msk.f32.mxu0 %vm214_vm1, %v176_v5  ;;  %v193_v8 = vld [vmem:[%s814_s20 + $0x98] sm:$0xff]  ;;  %v194_v10 = vld [vmem:[%s814_s20 + $0xa0] sm:$0xff]  ;;  %v195_v12 = vld [vmem:[%s814_s20 + $0xa8] sm:$0xff] }
  0x14   : > { %736 = vmatprep.mubr.msk.f32.mxu1 %vm214_vm1, %v192_v6  ;;  %v180_v13 = vld [vmem:[%s814_s20 + $0x30] sm:$0xff]  ;;  %v181_v15 = vld [vmem:[%s814_s20 + $0x38] sm:$0xff]  ;;  %v182_v17 = vld [vmem:[%s814_s20 + $0x40] sm:$0xff] }
  0x15   : > { %v196_v14 = vld [vmem:[%s814_s20 + $0xb0] sm:$0xff]  ;;  %v197_v16 = vld [vmem:[%s814_s20 + $0xb8] sm:$0xff]  ;;  %v198_v18 = vld [vmem:[%s814_s20 + $0xc0] sm:$0xff] }
  0x16   : > { %713 = vmatmul.mubr.msk.f32.gmra.mrb[2].mxu0 %vm214_vm1, %v177_v7  ;;  %v183_v19 = vld [vmem:[%s814_s20 + $0x48] sm:$0xff]  ;;  %v184_v21 = vld [vmem:[%s814_s20 + $0x50] sm:$0xff]  ;;  %v185_v23 = vld [vmem:[%s814_s20 + $0x58] sm:$0xff] }
  0x17   : > { %737 = vmatmul.mubr.msk.f32.gmra.mrb[2].mxu1 %vm214_vm1, %v193_v8  ;;  %715 = vmatprep.mubr.msk.f32.mxu0 %vm214_vm1, %v178_v9  ;;  %v199_v20 = vld [vmem:[%s814_s20 + $0xc8] sm:$0xff]  ;;  %v200_v22 = vld [vmem:[%s814_s20 + $0xd0] sm:$0xff]  ;;  %v201_v24 = vld [vmem:[%s814_s20 + $0xd8] sm:$0xff] }
  0x18   : > { %739 = vmatprep.mubr.msk.f32.mxu1 %vm214_vm1, %v194_v10  ;;  %v186_v25 = vld [vmem:[%s814_s20 + $0x60] sm:$0xff]  ;;  %v187_v27 = vld [vmem:[%s814_s20 + $0x68] sm:$0xff]  ;;  %v188_v29 = vld [vmem:[%s814_s20 + $0x70] sm:$0xff] }
  0x19   : > { %v202_v26 = vld [vmem:[%s814_s20 + $0xe0] sm:$0xff]  ;;  %v203_v28 = vld [vmem:[%s814_s20 + $0xe8] sm:$0xff]  ;;  %v204_v30 = vld [vmem:[%s814_s20 + $0xf0] sm:$0xff] }
  0x1a   : > { %716 = vmatmul.mubr.msk.f32.gmra.mrb[4].mxu0 %vm214_vm1, %v179_v11  ;;  %v189_v31 = vld [vmem:[%s814_s20 + $0x78] sm:$0xff] }
  0x1b   : > { %740 = vmatmul.mubr.msk.f32.gmra.mrb[4].mxu1 %vm214_vm1, %v195_v12  ;;  %718 = vmatprep.mubr.msk.f32.mxu0 %vm214_vm1, %v180_v13  ;;  %v205_v32 = vld [vmem:[%s814_s20 + $0xf8] sm:$0xff] }
  0x1c   : > { %742 = vmatprep.mubr.msk.f32.mxu1 %vm214_vm1, %v196_v14 }
  0x1e   : > { %719 = vmatmul.mubr.msk.f32.gmra.mrb[6].mxu0 %vm214_vm1, %v181_v15 }
  0x1f   : > { %743 = vmatmul.mubr.msk.f32.gmra.mrb[6].mxu1 %vm214_vm1, %v197_v16  ;;  %721 = vmatprep.mubr.msk.f32.mxu0 %vm214_vm1, %v182_v17 }
  0x20   : > { %745 = vmatprep.mubr.msk.f32.mxu1 %vm214_vm1, %v198_v18 }
  0x22   : > { %722 = vmatmul.mubr.msk.f32.gmra.mrb[8].mxu0 %vm214_vm1, %v183_v19 }
  0x23   : > { %746 = vmatmul.mubr.msk.f32.gmra.mrb[8].mxu1 %vm214_vm1, %v199_v20  ;;  %724 = vmatprep.mubr.msk.f32.mxu0 %vm214_vm1, %v184_v21 }
  0x24   : > { %748 = vmatprep.mubr.msk.f32.mxu1 %vm214_vm1, %v200_v22 }
  0x26   : > { %725 = vmatmul.mubr.msk.f32.gmra.mrb[10].mxu0 %vm214_vm1, %v185_v23 }
  0x27   : > { %749 = vmatmul.mubr.msk.f32.gmra.mrb[10].mxu1 %vm214_vm1, %v201_v24  ;;  %727 = vmatprep.mubr.msk.f32.mxu0 %vm214_vm1, %v186_v25 }
  0x28   : > { %751 = vmatprep.mubr.msk.f32.mxu1 %vm214_vm1, %v202_v26 }
  0x2a   : > { %728 = vmatmul.mubr.msk.f32.gmra.mrb[12].mxu0 %vm214_vm1, %v187_v27 }
  0x2b   : > { %752 = vmatmul.mubr.msk.f32.gmra.mrb[12].mxu1 %vm214_vm1, %v203_v28  ;;  %730 = vmatprep.mubr.msk.f32.mxu0 %vm214_vm1, %v188_v29 }
  0x2c   : > { %754 = vmatprep.mubr.msk.f32.mxu1 %vm214_vm1, %v204_v30 }
  0x2e   : > { %731 = vmatmul.mubr.msk.f32.gmra.mrb[14].mxu0 %vm214_vm1, %v189_v31 }
  0x2f   : > { %755 = vmatmul.mubr.msk.f32.gmra.mrb[14].mxu1 %vm214_vm1, %v205_v32 }
  0xe5   : > { %v711_v34 = vpop.f32.mrb[0].mxu0 }
  0xe6   : > { %v735_v35 = vpop.f32.mrb[0].mxu1  ;;  %v387_v36 = vadd.f32 %v711_v34, %v883_v33  ;;  %v381_v38 = vpop.f32.mrb[1].mxu0 }
  0xe7   : > { %v467_v37 = vadd.f32 %v735_v35, %v883_v33  ;;  %v461_v39 = vpop.f32.mrb[1].mxu1  ;;  %v382_v40 = vadd.f32 %v883_v33, %v381_v38 }
  0xe8   : > { %v462_v41 = vadd.f32 %v883_v33, %v461_v39  ;;  %542 = vst.msk [vmem:[%s890_s25 + $0x8] sm:$0xff] %vm540_vm2, %v387_v36 }
  0xe9   : > { %558 = vst.msk [vmem:[%s890_s25 + $0x88] sm:$0xff] %vm540_vm2, %v467_v37  ;;  %541 = vst.msk [vmem:[%s890_s25] sm:$0xff] %vm540_vm2, %v382_v40  ;;  %v714_v42 = vpop.f32.mrb[2].mxu0 }
  0xea   : > { %557 = vst.msk [vmem:[%s890_s25 + $0x80] sm:$0xff] %vm540_vm2, %v462_v41  ;;  %v738_v43 = vpop.f32.mrb[2].mxu1  ;;  %v397_v44 = vadd.f32 %v714_v42, %v883_v33  ;;  %v391_v46 = vpop.f32.mrb[3].mxu0 }
  0xeb   : > { %v477_v45 = vadd.f32 %v738_v43, %v883_v33  ;;  %v471_v47 = vpop.f32.mrb[3].mxu1  ;;  %v392_v48 = vadd.f32 %v883_v33, %v391_v46 }
  0xec   : > { %v472_v49 = vadd.f32 %v883_v33, %v471_v47  ;;  %544 = vst.msk [vmem:[%s890_s25 + $0x18] sm:$0xff] %vm540_vm2, %v397_v44 }
  0xed   : > { %560 = vst.msk [vmem:[%s890_s25 + $0x98] sm:$0xff] %vm540_vm2, %v477_v45  ;;  %543 = vst.msk [vmem:[%s890_s25 + $0x10] sm:$0xff] %vm540_vm2, %v392_v48  ;;  %v717_v50 = vpop.f32.mrb[4].mxu0 }
  0xee   : > { %559 = vst.msk [vmem:[%s890_s25 + $0x90] sm:$0xff] %vm540_vm2, %v472_v49  ;;  %v741_v51 = vpop.f32.mrb[4].mxu1  ;;  %v407_v52 = vadd.f32 %v717_v50, %v883_v33  ;;  %v401_v54 = vpop.f32.mrb[5].mxu0 }
  0xef   : > { %v487_v53 = vadd.f32 %v741_v51, %v883_v33  ;;  %v481_v55 = vpop.f32.mrb[5].mxu1  ;;  %v402_v56 = vadd.f32 %v883_v33, %v401_v54 }
  0xf0   : > { %v482_v57 = vadd.f32 %v883_v33, %v481_v55  ;;  %546 = vst.msk [vmem:[%s890_s25 + $0x28] sm:$0xff] %vm540_vm2, %v407_v52 }
  0xf1   : > { %562 = vst.msk [vmem:[%s890_s25 + $0xa8] sm:$0xff] %vm540_vm2, %v487_v53  ;;  %545 = vst.msk [vmem:[%s890_s25 + $0x20] sm:$0xff] %vm540_vm2, %v402_v56  ;;  %v720_v58 = vpop.f32.mrb[6].mxu0 }
  0xf2   : > { %561 = vst.msk [vmem:[%s890_s25 + $0xa0] sm:$0xff] %vm540_vm2, %v482_v57  ;;  %v744_v59 = vpop.f32.mrb[6].mxu1  ;;  %v417_v60 = vadd.f32 %v720_v58, %v883_v33  ;;  %v411_v62 = vpop.f32.mrb[7].mxu0 }
  0xf3   : > { %v497_v61 = vadd.f32 %v744_v59, %v883_v33  ;;  %v491_v63 = vpop.f32.mrb[7].mxu1  ;;  %v412_v0 = vadd.f32 %v883_v33, %v411_v62 }
  0xf4   : > { %v492_v1 = vadd.f32 %v883_v33, %v491_v63  ;;  %548 = vst.msk [vmem:[%s890_s25 + $0x38] sm:$0xff] %vm540_vm2, %v417_v60 }
  0xf5   : > { %564 = vst.msk [vmem:[%s890_s25 + $0xb8] sm:$0xff] %vm540_vm2, %v497_v61  ;;  %547 = vst.msk [vmem:[%s890_s25 + $0x30] sm:$0xff] %vm540_vm2, %v412_v0  ;;  %v723_v2 = vpop.f32.mrb[8].mxu0 }
  0xf6   : > { %563 = vst.msk [vmem:[%s890_s25 + $0xb0] sm:$0xff] %vm540_vm2, %v492_v1  ;;  %v747_v3 = vpop.f32.mrb[8].mxu1  ;;  %v427_v4 = vadd.f32 %v723_v2, %v883_v33  ;;  %v421_v6 = vpop.f32.mrb[9].mxu0 }
  0xf7   : > { %v507_v5 = vadd.f32 %v747_v3, %v883_v33  ;;  %v501_v7 = vpop.f32.mrb[9].mxu1  ;;  %v422_v8 = vadd.f32 %v883_v33, %v421_v6 }
  0xf8   : > { %v502_v9 = vadd.f32 %v883_v33, %v501_v7  ;;  %550 = vst.msk [vmem:[%s890_s25 + $0x48] sm:$0xff] %vm540_vm2, %v427_v4 }
  0xf9   : > { %566 = vst.msk [vmem:[%s890_s25 + $0xc8] sm:$0xff] %vm540_vm2, %v507_v5  ;;  %549 = vst.msk [vmem:[%s890_s25 + $0x40] sm:$0xff] %vm540_vm2, %v422_v8  ;;  %v726_v10 = vpop.f32.mrb[10].mxu0 }
  0xfa   : > { %565 = vst.msk [vmem:[%s890_s25 + $0xc0] sm:$0xff] %vm540_vm2, %v502_v9  ;;  %v750_v11 = vpop.f32.mrb[10].mxu1  ;;  %v437_v12 = vadd.f32 %v726_v10, %v883_v33  ;;  %v431_v14 = vpop.f32.mrb[11].mxu0 }
  0xfb   : > { %v517_v13 = vadd.f32 %v750_v11, %v883_v33  ;;  %v511_v15 = vpop.f32.mrb[11].mxu1  ;;  %v432_v16 = vadd.f32 %v883_v33, %v431_v14 }
  0xfc   : > { %v512_v17 = vadd.f32 %v883_v33, %v511_v15  ;;  %552 = vst.msk [vmem:[%s890_s25 + $0x58] sm:$0xff] %vm540_vm2, %v437_v12 }
  0xfd   : > { %568 = vst.msk [vmem:[%s890_s25 + $0xd8] sm:$0xff] %vm540_vm2, %v517_v13  ;;  %551 = vst.msk [vmem:[%s890_s25 + $0x50] sm:$0xff] %vm540_vm2, %v432_v16  ;;  %v729_v18 = vpop.f32.mrb[12].mxu0 }
  0xfe   : > { %567 = vst.msk [vmem:[%s890_s25 + $0xd0] sm:$0xff] %vm540_vm2, %v512_v17  ;;  %v753_v19 = vpop.f32.mrb[12].mxu1  ;;  %v447_v20 = vadd.f32 %v729_v18, %v883_v33  ;;  %v441_v22 = vpop.f32.mrb[13].mxu0 }
  0xff   : > { %v527_v21 = vadd.f32 %v753_v19, %v883_v33  ;;  %v521_v23 = vpop.f32.mrb[13].mxu1  ;;  %v442_v24 = vadd.f32 %v883_v33, %v441_v22 }
 0x100   : > { %v522_v25 = vadd.f32 %v883_v33, %v521_v23  ;;  %554 = vst.msk [vmem:[%s890_s25 + $0x68] sm:$0xff] %vm540_vm2, %v447_v20 }
 0x101   : > { %570 = vst.msk [vmem:[%s890_s25 + $0xe8] sm:$0xff] %vm540_vm2, %v527_v21  ;;  %553 = vst.msk [vmem:[%s890_s25 + $0x60] sm:$0xff] %vm540_vm2, %v442_v24  ;;  %v732_v26 = vpop.f32.mrb[14].mxu0 }
 0x102   : > { %569 = vst.msk [vmem:[%s890_s25 + $0xe0] sm:$0xff] %vm540_vm2, %v522_v25  ;;  %v756_v27 = vpop.f32.mrb[14].mxu1  ;;  %v457_v28 = vadd.f32 %v732_v26, %v883_v33  ;;  %v451_v30 = vpop.f32.mrb[15].mxu0 }
 0x103   : > { %v537_v29 = vadd.f32 %v756_v27, %v883_v33  ;;  %v531_v31 = vpop.f32.mrb[15].mxu1  ;;  %v452_v32 = vadd.f32 %v883_v33, %v451_v30 }
 0x104   : > { %v532_v34 = vadd.f32 %v883_v33, %v531_v31  ;;  %556 = vst.msk [vmem:[%s890_s25 + $0x78] sm:$0xff] %vm540_vm2, %v457_v28 }
 0x105   : > { %572 = vst.msk [vmem:[%s890_s25 + $0xf8] sm:$0xff] %vm540_vm2, %v537_v29  ;;  %555 = vst.msk [vmem:[%s890_s25 + $0x70] sm:$0xff] %vm540_vm2, %v452_v32 }
 0x106   : > { %571 = vst.msk [vmem:[%s890_s25 + $0xf0] sm:$0xff] %vm540_vm2, %v532_v34 }
 0x107 PF: > { %s13_s12 = sadd.s32 1, %s773_s12  }
 0x108   : > { %p10_p4 = scmp.ge.s32.totalorder %s13_s12, 4  }
 0x10a   :  { %12 = sbr.rel (!%p10_p4) target bundleno = 1 (0x1), region = 62 }

</bundles_post_ra>
